<compile_context>
chip_gen: v5e
topology: v5e:2x2
jax: 0.10.0
libtpu: 0.0.40
codegen_flags: <defaults>
</compile_context>

<pallas_src>
import jax
import jax.numpy as jnp
from jax.experimental import pallas as pl
from jax.experimental.pallas import tpu as pltpu


def _scaled_silu_kernel(x_ref, s_ref, o_ref):
    # Elementwise hot path: SiLU(x) * (1/scales), f32 compute, cast back.
    x = x_ref[...].astype(jnp.float32)
    act = x * jax.nn.sigmoid(x)                    # SiLU (exp on EUP, mul on VPU)
    s = s_ref[...].astype(jnp.float32)             # (1, tn), broadcast over rows
    # Approx reciprocal runs in the EUP slot (free next to the VPU work);
    # one Newton step on the tiny (1, tn) vector restores ~f32 accuracy.
    inv_s = pl.reciprocal(s, approx=True)
    inv_s = inv_s * (2.0 - s * inv_s)
    o_ref[...] = (act * inv_s).astype(o_ref.dtype)


def _round_up(v: int, mult: int) -> int:
    return ((v + mult - 1) // mult) * mult


def _choose_tiles(m: int, n: int, itemsize: int, block_bytes: int = 4 << 20):
    """Pick (tm, tn): large lane-dense blocks (~4 MiB) that fit VMEM on all gens."""
    tn = n
    if n % 128 == 0:
        # For very wide intermediates, halve the column tile (keeping a
        # multiple of 128 that divides n) until a >=256-row tile fits budget.
        while tn > 512 and tn % 256 == 0 and 256 * tn * itemsize > block_bytes:
            tn //= 2
    tm = block_bytes // max(1, tn * itemsize)
    tm = int(max(16, min(1024, (tm // 16) * 16)))   # multiple of 16 (bf16 sublane packing)
    tm = min(tm, _round_up(m, 16))                  # don't over-pad tiny inputs
    return tm, tn


def scaled_activation(x: jax.Array, scales: jax.Array) -> jax.Array:
    """x: [..., intermediate], scales: [intermediate]. Returns SiLU(x) / scales."""
    orig_shape = x.shape
    n = orig_shape[-1]
    assert scales.shape == (n,)
    x2 = x.reshape(-1, n)                           # [tokens, intermediate]
    m = x2.shape[0]
    s2 = scales.reshape(1, n)                       # 2-D for TPU-friendly layout

    tm, tn = _choose_tiles(m, n, jnp.dtype(x.dtype).itemsize)
    grid = (pl.cdiv(m, tm), n // tn)                # tn divides n by construction

    out = pl.pallas_call(
        _scaled_silu_kernel,
        out_shape=jax.ShapeDtypeStruct((m, n), x.dtype),
        grid_spec=pltpu.PrefetchScalarGridSpec(
            num_scalar_prefetch=0,
            grid=grid,
            in_specs=[
                pl.BlockSpec((tm, tn), lambda i, j: (i, j)),   # x tile
                pl.BlockSpec((1, tn), lambda i, j: (0, j)),    # scales column tile
            ],
            out_specs=pl.BlockSpec((tm, tn), lambda i, j: (i, j)),
        ),
        compiler_params=pltpu.CompilerParams(
            dimension_semantics=("parallel", "parallel"),
            # ~4 MiB blocks x (in+out) x double-buffer ~= 16-17 MiB; 48 MiB
            # gives headroom on v5e/v6e and stays under v7x's 64 MiB physical.
            vmem_limit_bytes=48 << 20,
        ),
    )(x2, s2)
    return out.reshape(orig_shape)


if __name__ == "__main__":
    key = jax.random.PRNGKey(0)
    kx, ks = jax.random.split(key)

    # Small demo shapes (tp_size = 1). intermediate is a multiple of 128 so the
    # output stores are lane-dense (real intermediate sizes always are).
    batch, seq, intermediate = 2, 8, 256
    x = jax.random.normal(kx, (batch, seq, intermediate), dtype=jnp.float32)
    # Deterministic, non-zero scales (the module's __init__ only declares shape).
    scales = 0.5 + jax.random.uniform(ks, (intermediate,), dtype=jnp.float32)

    out = scaled_activation(x, scales)
    jax.block_until_ready(out)

    # Reference check in plain JAX. Note: kernel uses reciprocal-then-multiply
    # (approx recip + 1 Newton step), not exact division -> tolerance below.
    ref = (x * jax.nn.sigmoid(x)) / scales
    assert out.shape == x.shape and out.dtype == x.dtype
    assert jnp.allclose(out, ref, atol=1e-5, rtol=1e-4)

    print("KERNEL_OK")
</pallas_src>

<mosaic_0001>
module attributes {stable_mosaic.version = 11 : i64} {
  func.func @_scaled_silu_kernel(%arg0: i32, %arg1: i32, %arg2: memref<16x256xf32, #tpu.memory_space<vmem>>, %arg3: memref<1x256xf32, #tpu.memory_space<vmem>>, %arg4: memref<16x256xf32, #tpu.memory_space<vmem>>) attributes {dimension_semantics = [#tpu.dimension_semantics<parallel>, #tpu.dimension_semantics<parallel>], iteration_bounds = array<i64: 1, 1>, scalar_prefetch = 0 : i64, scratch_operands = 0 : i64, tpu.core_type = #tpu.core_type<tc>, window_params = [{transform_indices = @transform_0, window_bounds = array<i64: 16, 256>}, {transform_indices = @transform_1, window_bounds = array<i64: 1, 256>}, {transform_indices = @transform_2, window_bounds = array<i64: 16, 256>}]} {
    %c0 = arith.constant 0 : index
    %c0_0 = arith.constant 0 : index
    %0 = vector.load %arg2[%c0, %c0_0] : memref<16x256xf32, #tpu.memory_space<vmem>>, vector<16x256xf32>
    %1 = arith.negf %0 : vector<16x256xf32>
    %2 = math.exp %1 : vector<16x256xf32>
    %cst = arith.constant 1.000000e+00 : f32
    %3 = vector.broadcast %cst : f32 to vector<16x256xf32>
    %4 = arith.addf %3, %2 : vector<16x256xf32>
    %5 = arith.divf %3, %4 : vector<16x256xf32>
    %6 = arith.mulf %0, %5 : vector<16x256xf32>
    %c0_1 = arith.constant 0 : index
    %c0_2 = arith.constant 0 : index
    %7 = vector.load %arg3[%c0_1, %c0_2] : memref<1x256xf32, #tpu.memory_space<vmem>>, vector<1x256xf32>
    %8 = tpu.reciprocal %7 {approx = true} : vector<1x256xf32> -> vector<1x256xf32>
    %9 = arith.mulf %7, %8 : vector<1x256xf32>
    %cst_3 = arith.constant 2.000000e+00 : f32
    %10 = vector.broadcast %cst_3 : f32 to vector<1x256xf32>
    %11 = arith.subf %10, %9 : vector<1x256xf32>
    %12 = arith.mulf %8, %11 : vector<1x256xf32>
    %13 = vector.broadcast %12 : vector<1x256xf32> to vector<16x256xf32>
    %14 = arith.mulf %6, %13 : vector<16x256xf32>
    %c0_4 = arith.constant 0 : index
    %c0_5 = arith.constant 0 : index
    %15 = vector.load %arg4[%c0_4, %c0_5] : memref<16x256xf32, #tpu.memory_space<vmem>>, vector<16x256xf32>
    tpu.vector_store %arg4[%c0_4, %c0_5], %14 {strides = array<i32>} : memref<16x256xf32, #tpu.memory_space<vmem>>, vector<16x256xf32>,
    return
  }
  func.func @transform_0(%arg0: i32, %arg1: i32) -> (i32, i32) {
    %c0_i32 = arith.constant 0 : i32
    return %arg0, %arg1 : i32, i32
  }
  func.func @transform_1(%arg0: i32, %arg1: i32) -> (i32, i32) {
    %c0_i32 = arith.constant 0 : i32
    %c0_i32_0 = arith.constant 0 : i32
    return %c0_i32, %arg1 : i32, i32
  }
  func.func @transform_2(%arg0: i32, %arg1: i32) -> (i32, i32) {
    %c0_i32 = arith.constant 0 : i32
    return %arg0, %arg1 : i32, i32
  }
}

</mosaic_0001>

<bundles_post_ra>
// kernel: tpu_custom_call.1
= control target key start
LH: loop header
LB: loop body
LE: loop exit
PB: predicated region body
PF: predicated region fallthrough
CT: control target
= control target key end

     0   :  { %7 = vsyncpa [#allocation3], 0  ;;  %s358_s0 = inlined_call_operand.hbm [shape: f32[16,256], index: 0, kind: input, shape index: {}]   ;;  %s359_s1 = inlined_call_operand.hbm [shape: f32[1,256], index: 1, kind: input, shape index: {}]   ;;  %s360_s2 = inlined_call_operand.hbm [shape: f32[16,256], index: 2, kind: output, shape index: {}]  }
   0x1   :  { %8 = vsyncpa [#allocation6], 0 }
   0x2   :  { %9 = vsyncpa [#allocation4], 0  ;;  %s14_s11 = sshll.u32 %s358_s0, 4  ;;  %s269_s12 = smov [#allocation2]   ;;  %s15_s11 = int_to_ptr.hbm [resolvable:$true] %s14_s11 }
   0x3   :  { %s16_s13 = sshll.u32 %s269_s12, 4  ;;  %s28_s16 = sshll.u32 %s359_s1, 4  ;;  %s17_s13 = int_to_ptr.vmem [resolvable:$true] %s16_s13  ;;  %s29_s16 = int_to_ptr.hbm [resolvable:$true] %s28_s16 }
   0x4   :  { %s270_s17 = smov 256   ;;  %s271_s18 = smov 16  }
   0x5   :  { %22 = dma.hbm_to_vmem [thread:$0]  %s15_s11, 512, %s17_s13, [#allocation3], %s270_s17, %s270_s17, %s271_s18  }
   0x6   :  { %s272_s19 = smov [#allocation5]  }
   0x7   :  { %s30_s20 = sshll.u32 %s272_s19, 4  ;;  %s31_s20 = int_to_ptr.vmem [resolvable:$true] %s30_s20 }
   0x8   :  { %33 = dma.hbm_to_vmem [thread:$0]  %s29_s16, 32, %s31_s20, [#allocation6]  }
   0x9   :  { %263 = dma.done.wait [#allocation3], 512  }
   0xa   :  { %264 = vsyncadd [#allocation3], 4294966784 }
   0xb   :  { %265 = dma.done.wait [#allocation6], 32  }
   0xc   :  { %266 = vsyncadd [#allocation6], 4294967264  ;;  %v298_v0 = vld [vmem:[#allocation2] sm:$0xff]  ;;  %v300_v2 = vld [vmem:[#allocation2 + $0x8] sm:$0xff]  ;;  %s273_s0 = smov [#allocation7]   ;;  %s150_s23 = sshll.u32 %s360_s2, 4  ;;  %s151_s23 = int_to_ptr.hbm [resolvable:$true] %s150_s23 }
   0xd   :  { %v126_v1 = vld [vmem:[#allocation5] sm:$0x3]  ;;  %v164_v3 = vmul.f32 -1.442695, %v298_v0  ;;  %v165_v4 = vmul.f32 -1.442695, %v300_v2 }
   0xe   :  { %173 = vrcp.f32 %v126_v1  ;;  %v304_v5 = vld [vmem:[#allocation2 + $0x10] sm:$0xff]  ;;  %v306_v6 = vld [vmem:[#allocation2 + $0x18] sm:$0xff]  ;;  %s148_s1 = sshll.u32 %s273_s0, 4  ;;  %s149_s1 = int_to_ptr.vmem [resolvable:$true] %s148_s1 }
   0xf   :  { %v166_v7 = vmul.f32 -1.442695, %v304_v5  ;;  %v167_v8 = vmul.f32 -1.442695, %v306_v6  ;;  %175 = vpow2.f32 %v164_v3 }
  0x10   :  { %177 = vpow2.f32 %v165_v4 }
  0x11   :  { %179 = vpow2.f32 %v166_v7 }
  0x12   :  { %181 = vpow2.f32 %v167_v8 }
  0x14   :  { %v174_v9 = vpop.eup %173 }
  0x15   :  { %v176_v10 = vpop.eup %175  ;;  %v128_v11 = vmul.f32 %v174_v9, %v126_v1 }
  0x16   :  { %v178_v12 = vpop.eup %177  ;;  %v58_v13 = vadd.f32 1.0, %v176_v10 }
  0x17   :  { %v180_v14 = vpop.eup %179  ;;  %v59_v15 = vadd.f32 1.0, %v178_v12  ;;  %v129_v17 = vsub.f32 2.0, %v128_v11 }
  0x18   :  { %v182_v16 = vpop.eup %181  ;;  %183 = vrcp.f32 %v58_v13  ;;  %v60_v18 = vadd.f32 1.0, %v180_v14  ;;  %v71_v20 = vand.u32 2147483647, %v58_v13  ;;  %v73_v21 = vand.u32 2147483648, %v58_v13 }
  0x19   :  { %185 = vrcp.f32 %v59_v15  ;;  %v61_v19 = vadd.f32 1.0, %v182_v16  ;;  %v310_v22 = vmul.f32 %v174_v9, %v129_v17  ;;  %v86_v24 = vand.u32 2147483647, %v59_v15 }
  0x1a   :  { %187 = vrcp.f32 %v60_v18  ;;  %v88_v25 = vand.u32 2147483648, %v59_v15  ;;  %vm67_vm0 = vweird.f32 %v58_v13  ;;  %vm312_vm1 = vcmp.eq.f32.partialorder %v71_v20, 8.507059e+37 }
  0x1b   :  { %189 = vrcp.f32 %v61_v19  ;;  %vm82_vm2 = vweird.f32 %v59_v15  ;;  %v74_v31 = vor.u32 1.1754944e-38, %v73_v21  ;;  %v132_v32 = vperm.slane %v310_v22, 0 }
  0x1c   :  { %vm317_vm5 = vcmp.eq.f32.partialorder %v86_v24, 8.507059e+37  ;;  %v89_v36 = vor.u32 1.1754944e-38, %v88_v25  ;;  %vm97_vm6 = vweird.f32 %v60_v18  ;;  %v101_v40 = vand.u32 2147483647, %v60_v18 }
  0x1d   :  { %v103_v43 = vand.u32 2147483648, %v60_v18  ;;  %vm112_vm8 = vweird.f32 %v61_v19  ;;  %v118_v48 = vand.u32 2147483648, %v61_v19  ;;  %v116_v51 = vand.u32 2147483647, %v61_v19 }
  0x1e   :  { %v184_v23 = vpop.eup %183  ;;  %v133_v53 = vperm.slane %v310_v22, 1  ;;  %vm334_vm12 = vcmp.eq.f32.partialorder %v101_v40, 8.507059e+37 }
  0x1f   :  { %v186_v26 = vpop.eup %185  ;;  %v63_v27 = vmul.f32 %v184_v23, %v58_v13  ;;  %vm68_vm3 = vweird.f32 %v184_v23  ;;  %v104_v58 = vor.u32 1.1754944e-38, %v103_v43  ;;  %v119_v63 = vor.u32 1.1754944e-38, %v118_v48 }
  0x20   :  { %v78_v29 = vmul.f32 %v186_v26, %v59_v15  ;;  %v188_v33 = vpop.eup %187  ;;  %vm83_vm4 = vweird.f32 %v186_v26  ;;  %vm322_vm7 = vmor %vm67_vm0, %vm68_vm3  ;;  %vm117_vm15 = vcmp.eq.f32.partialorder %v116_v51, 8.507059e+37 }
  0x21   :  { %v64_v30 = vsub.f32 1.0, %v63_v27  ;;  %v190_v37 = vpop.eup %189  ;;  %v93_v39 = vmul.f32 %v188_v33, %v60_v18  ;;  %vm327_vm9 = vmor %vm82_vm2, %vm83_vm4  ;;  %vm98_vm10 = vweird.f32 %v188_v33 }
  0x22   :  { %v79_v34 = vsub.f32 1.0, %v78_v29  ;;  %v108_v44 = vmul.f32 %v190_v37, %v61_v19  ;;  %vm113_vm11 = vweird.f32 %v190_v37  ;;  %vm99_vm13 = vmor %vm97_vm6, %vm98_vm10 }
  0x23   :  { %v65_v38 = vmul.f32 %v184_v23, %v64_v30  ;;  %v94_v47 = vsub.f32 1.0, %v93_v39  ;;  %vm114_vm14 = vmor %vm112_vm8, %vm113_vm11 }
  0x24   :  { %v80_v42 = vmul.f32 %v186_v26, %v79_v34  ;;  %v109_v50 = vsub.f32 1.0, %v108_v44 }
  0x25   :  { %v66_v45 = vadd.f32 %v184_v23, %v65_v38  ;;  %v95_v54 = vmul.f32 %v188_v33, %v94_v47 }
  0x26   :  { %v81_v49 = vadd.f32 %v186_v26, %v80_v42  ;;  %v110_v59 = vmul.f32 %v190_v37, %v109_v50 }
  0x27   :  { %v70_v52 = vsel %vm322_vm7, %v184_v23, %v66_v45  ;;  %v96_v62 = vadd.f32 %v188_v33, %v95_v54 }
  0x28   :  { %v75_v56 = vsel %vm312_vm1, %v74_v31, %v70_v52  ;;  %v85_v57 = vsel %vm327_vm9, %v186_v26, %v81_v49  ;;  %v111_v3 = vadd.f32 %v190_v37, %v110_v59 }
  0x29   :  { %v122_v60 = vmul.f32 %v75_v56, %v298_v0  ;;  %v90_v61 = vsel %vm317_vm5, %v89_v36, %v85_v57  ;;  %v100_v7 = vsel %vm99_vm13, %v188_v33, %v96_v62 }
  0x2a   :  { %v123_v1 = vmul.f32 %v90_v61, %v300_v2  ;;  %v105_v9 = vsel %vm334_vm12, %v104_v58, %v100_v7  ;;  %v115_v10 = vsel %vm114_vm14, %v190_v37, %v111_v3 }
  0x2b   :  { %v136_v4 = vmul.f32 %v132_v32, %v122_v60  ;;  %v124_v0 = vmul.f32 %v105_v9, %v304_v5  ;;  %v120_v11 = vsel %vm117_vm15, %v119_v63, %v115_v10 }
  0x2c   :  { %v137_v8 = vmul.f32 %v133_v53, %v123_v1  ;;  %v125_v2 = vmul.f32 %v120_v11, %v306_v6 }
  0x2d   :  { %140 = vst [vmem:[#allocation7] sm:$0xff] %v136_v4  ;;  %v138_v12 = vmul.f32 %v132_v32, %v124_v0 }
  0x2e   :  { %141 = vst [vmem:[#allocation7 + $0x8] sm:$0xff] %v137_v8  ;;  %v139_v13 = vmul.f32 %v133_v53, %v125_v2 }
  0x2f   :  { %142 = vst [vmem:[#allocation7 + $0x10] sm:$0xff] %v138_v12 }
  0x30   :  { %143 = vst [vmem:[#allocation7 + $0x18] sm:$0xff] %v139_v13 }
  0x31   :  { %156 = dma.vmem_to_hbm [thread:$0]  %s149_s1, 512, %s151_s23, [#allocation4], %s270_s17, %s270_s17, %s271_s18  }
  0x32   :  { %267 = dma.done.wait [#allocation4], 512  }
  0x33   :  { %268 = vsyncadd [#allocation4], 4294966784 }
  0x34   :  { %161 = vsyncpa [#allocation3], 1 }
  0x35   :  { %162 = vsyncpa [#allocation6], 1 }
  0x36   :  { %163 = vsyncpa [#allocation4], 1 }

</bundles_post_ra>
